<compile_context>
chip_gen: v6e
topology: v6e:2x2x1
jax: 0.10.0
libtpu: 0.0.40
codegen_flags: <defaults>
</compile_context>

<pallas_src>
import jax
import jax.numpy as jnp
from jax.experimental import pallas as pl
from jax.experimental.pallas import tpu as pltpu

_LANE = 128          # TPU lane width
_TILE_N_MAX = 8192   # lanes per grid step (multiple of 128, ~64 KiB/x block)


def _mlp_kernel(p_ref, x_ref, o_ref):
    """p_ref: SMEM float32[9] packed params.
       x_ref: VMEM float32[2, TILE_N]  (feature-major, batch on lanes).
       o_ref: VMEM float32[1, TILE_N]  (lane-dense output)."""
    x = x_ref[...]                      # [2, TILE_N]
    x0 = x[0:1, :]                      # [1, TILE_N]
    x1 = x[1:2, :]                      # [1, TILE_N]

    # Packed as: W1[0,0], W1[0,1], W1[1,0], W1[1,1], b1[0], b1[1],
    #            W2[0,0], W2[0,1], b2[0]   (PyTorch (out, in) layout)
    w1_00 = p_ref[0]
    w1_01 = p_ref[1]
    w1_10 = p_ref[2]
    w1_11 = p_ref[3]
    b1_0 = p_ref[4]
    b1_1 = p_ref[5]
    w2_0 = p_ref[6]
    w2_1 = p_ref[7]
    b2_0 = p_ref[8]

    # Linear(2, 2) + Sigmoid as scalar-broadcast FMAs on the VPU.
    h0 = jax.nn.sigmoid(w1_00 * x0 + w1_01 * x1 + b1_0)   # [1, TILE_N]
    h1 = jax.nn.sigmoid(w1_10 * x0 + w1_11 * x1 + b1_1)   # [1, TILE_N]

    # Linear(2, 1) + Sigmoid.
    o = jax.nn.sigmoid(w2_0 * h0 + w2_1 * h1 + b2_0)      # [1, TILE_N]

    o_ref[...] = o.astype(o_ref.dtype)


def neural_network_forward(x, w1, b1, w2, b2):
    """Forward pass matching NeuralNetwork.forward.

    Args:
      x:  [N, ...]  input, flattened to [N, 2] (nn.Flatten)
      w1: [2, 2]    PyTorch-layout weight of Linear(2, 2)  (out, in)
      b1: [2]       bias of Linear(2, 2)
      w2: [1, 2]    PyTorch-layout weight of Linear(2, 1)  (out, in)
      b2: [1]       bias of Linear(2, 1)
    Returns:
      [N, 1] float32 (post-sigmoid), same semantics as the PyTorch module.
    """
    n = x.shape[0]
    x2 = jnp.asarray(x, jnp.float32).reshape(n, -1)      # nn.Flatten -> [N, 2]
    assert x2.shape[1] == 2, f"expected 2 features after flatten, got {x2.shape[1]}"

    # Transpose so batch rides the lane axis, then pad batch to a tile multiple.
    x_t = x2.T                                           # [2, N]
    n_pad_min = pl.cdiv(n, _LANE) * _LANE
    tile_n = min(_TILE_N_MAX, n_pad_min)
    n_pad = pl.cdiv(n, tile_n) * tile_n
    if n_pad != n:
        x_t = jnp.pad(x_t, ((0, 0), (0, n_pad - n)))     # [2, n_pad]

    # Pack the 9 parameters into one SMEM scalar array.
    params = jnp.concatenate([
        jnp.asarray(w1, jnp.float32).reshape(-1),        # W1[0,0] W1[0,1] W1[1,0] W1[1,1]
        jnp.asarray(b1, jnp.float32).reshape(-1),        # b1[0] b1[1]
        jnp.asarray(w2, jnp.float32).reshape(-1),        # W2[0,0] W2[0,1]
        jnp.asarray(b2, jnp.float32).reshape(-1),        # b2[0]
    ])

    out_t = pl.pallas_call(
        _mlp_kernel,
        out_shape=jax.ShapeDtypeStruct((1, n_pad), jnp.float32),
        grid=(n_pad // tile_n,),
        in_specs=[
            pl.BlockSpec(memory_space=pltpu.MemorySpace.SMEM),   # params (whole array)
            pl.BlockSpec((2, tile_n), lambda i: (0, i)),         # x tile
        ],
        out_specs=pl.BlockSpec((1, tile_n), lambda i: (0, i)),
        compiler_params=pltpu.CompilerParams(
            dimension_semantics=("parallel",)),
    )(params, x_t)

    # Back to the PyTorch output layout [N, 1].
    return out_t[0, :n].reshape(n, 1)


def _init_params(key):
    """Deterministic parameter init mimicking PyTorch nn.Linear defaults
    (uniform in +/- 1/sqrt(fan_in))."""
    k1, k2, k3, k4 = jax.random.split(key, 4)
    bound = 1.0 / jnp.sqrt(2.0)  # fan_in = 2 for both layers
    w1 = jax.random.uniform(k1, (2, 2), jnp.float32, -bound, bound)  # (out, in)
    b1 = jax.random.uniform(k2, (2,), jnp.float32, -bound, bound)
    w2 = jax.random.uniform(k3, (1, 2), jnp.float32, -bound, bound)  # (out, in)
    b2 = jax.random.uniform(k4, (1,), jnp.float32, -bound, bound)
    return w1, b1, w2, b2


def _reference(x, w1, b1, w2, b2):
    x2 = x.reshape(x.shape[0], -1).astype(jnp.float32)
    h = jax.nn.sigmoid(x2 @ w1.T + b1)
    return jax.nn.sigmoid(h @ w2.T + b2)


if __name__ == "__main__":
    key = jax.random.PRNGKey(0)
    k_params, k_x1, k_x2 = jax.random.split(key, 3)
    w1, b1, w2, b2 = _init_params(k_params)

    # Small batch of XOR-style 2-feature inputs.
    x_small = jax.random.uniform(k_x1, (8, 2), jnp.float32)
    out_small = jax.block_until_ready(
        neural_network_forward(x_small, w1, b1, w2, b2))
    ref_small = _reference(x_small, w1, b1, w2, b2)
    assert out_small.shape == (8, 1)
    assert jnp.allclose(out_small, ref_small, atol=1e-5, rtol=1e-5)

    # Non-multiple-of-128 batch exercises the lane padding path.
    x_med = jax.random.uniform(k_x2, (300, 2), jnp.float32)
    out_med = jax.block_until_ready(
        neural_network_forward(x_med, w1, b1, w2, b2))
    ref_med = _reference(x_med, w1, b1, w2, b2)
    assert out_med.shape == (300, 1)
    assert jnp.allclose(out_med, ref_med, atol=1e-5, rtol=1e-5)

    print("KERNEL_OK")
</pallas_src>

<mosaic_0001>
module attributes {stable_mosaic.version = 11 : i64} {
  func.func @_mlp_kernel(%arg0: i32, %arg1: memref<9xf32, #tpu.memory_space<smem>>, %arg2: memref<2x128xf32, #tpu.memory_space<vmem>>, %arg3: memref<1x128xf32, #tpu.memory_space<vmem>>) attributes {dimension_semantics = [#tpu.dimension_semantics<parallel>], iteration_bounds = array<i64: 1>, scalar_prefetch = 0 : i64, scratch_operands = 0 : i64, tpu.core_type = #tpu.core_type<tc>, window_params = [{transform_indices = @transform_0, window_bounds = array<i64: 9>}, {transform_indices = @transform_1, window_bounds = array<i64: 2, 128>}, {transform_indices = @transform_2, window_bounds = array<i64: 1, 128>}]} {
    %c0 = arith.constant 0 : index
    %c0_0 = arith.constant 0 : index
    %0 = vector.load %arg2[%c0, %c0_0] : memref<2x128xf32, #tpu.memory_space<vmem>>, vector<2x128xf32>
    %1 = vector.extract_strided_slice %0 {offsets = [0, 0], sizes = [1, 128], strides = [1, 1]} : vector<2x128xf32> to vector<1x128xf32>
    %2 = vector.extract_strided_slice %0 {offsets = [1, 0], sizes = [1, 128], strides = [1, 1]} : vector<2x128xf32> to vector<1x128xf32>
    %c0_1 = arith.constant 0 : index
    %3 = memref.load %arg1[%c0_1] : memref<9xf32, #tpu.memory_space<smem>>
    %c1 = arith.constant 1 : index
    %4 = memref.load %arg1[%c1] : memref<9xf32, #tpu.memory_space<smem>>
    %c2 = arith.constant 2 : index
    %5 = memref.load %arg1[%c2] : memref<9xf32, #tpu.memory_space<smem>>
    %c3 = arith.constant 3 : index
    %6 = memref.load %arg1[%c3] : memref<9xf32, #tpu.memory_space<smem>>
    %c4 = arith.constant 4 : index
    %7 = memref.load %arg1[%c4] : memref<9xf32, #tpu.memory_space<smem>>
    %c5 = arith.constant 5 : index
    %8 = memref.load %arg1[%c5] : memref<9xf32, #tpu.memory_space<smem>>
    %c6 = arith.constant 6 : index
    %9 = memref.load %arg1[%c6] : memref<9xf32, #tpu.memory_space<smem>>
    %c7 = arith.constant 7 : index
    %10 = memref.load %arg1[%c7] : memref<9xf32, #tpu.memory_space<smem>>
    %c8 = arith.constant 8 : index
    %11 = memref.load %arg1[%c8] : memref<9xf32, #tpu.memory_space<smem>>
    %12 = vector.broadcast %3 : f32 to vector<1x128xf32>
    %13 = arith.mulf %12, %1 : vector<1x128xf32>
    %14 = vector.broadcast %4 : f32 to vector<1x128xf32>
    %15 = arith.mulf %14, %2 : vector<1x128xf32>
    %16 = arith.addf %13, %15 : vector<1x128xf32>
    %17 = vector.broadcast %7 : f32 to vector<1x128xf32>
    %18 = arith.addf %16, %17 : vector<1x128xf32>
    %19 = arith.negf %18 : vector<1x128xf32>
    %20 = math.exp %19 : vector<1x128xf32>
    %cst = arith.constant 1.000000e+00 : f32
    %21 = vector.broadcast %cst : f32 to vector<1x128xf32>
    %22 = arith.addf %21, %20 : vector<1x128xf32>
    %23 = arith.divf %21, %22 : vector<1x128xf32>
    %24 = vector.broadcast %5 : f32 to vector<1x128xf32>
    %25 = arith.mulf %24, %1 : vector<1x128xf32>
    %26 = vector.broadcast %6 : f32 to vector<1x128xf32>
    %27 = arith.mulf %26, %2 : vector<1x128xf32>
    %28 = arith.addf %25, %27 : vector<1x128xf32>
    %29 = vector.broadcast %8 : f32 to vector<1x128xf32>
    %30 = arith.addf %28, %29 : vector<1x128xf32>
    %31 = arith.negf %30 : vector<1x128xf32>
    %32 = math.exp %31 : vector<1x128xf32>
    %cst_2 = arith.constant 1.000000e+00 : f32
    %33 = vector.broadcast %cst_2 : f32 to vector<1x128xf32>
    %34 = arith.addf %33, %32 : vector<1x128xf32>
    %35 = arith.divf %33, %34 : vector<1x128xf32>
    %36 = vector.broadcast %9 : f32 to vector<1x128xf32>
    %37 = arith.mulf %36, %23 : vector<1x128xf32>
    %38 = vector.broadcast %10 : f32 to vector<1x128xf32>
    %39 = arith.mulf %38, %35 : vector<1x128xf32>
    %40 = arith.addf %37, %39 : vector<1x128xf32>
    %41 = vector.broadcast %11 : f32 to vector<1x128xf32>
    %42 = arith.addf %40, %41 : vector<1x128xf32>
    %43 = arith.negf %42 : vector<1x128xf32>
    %44 = math.exp %43 : vector<1x128xf32>
    %cst_3 = arith.constant 1.000000e+00 : f32
    %45 = vector.broadcast %cst_3 : f32 to vector<1x128xf32>
    %46 = arith.addf %45, %44 : vector<1x128xf32>
    %47 = arith.divf %45, %46 : vector<1x128xf32>
    %c0_4 = arith.constant 0 : index
    %c0_5 = arith.constant 0 : index
    %48 = vector.load %arg3[%c0_4, %c0_5] : memref<1x128xf32, #tpu.memory_space<vmem>>, vector<1x128xf32>
    tpu.vector_store %arg3[%c0_4, %c0_5], %47 {strides = array<i32>} : memref<1x128xf32, #tpu.memory_space<vmem>>, vector<1x128xf32>,
    return
  }
  func.func @transform_0(%arg0: i32) -> i32 {
    %c0_i32 = arith.constant 0 : i32
    %c0_i32_0 = arith.constant 0 : i32
    return %c0_i32 : i32
  }
  func.func @transform_1(%arg0: i32) -> (i32, i32) {
    %c0_i32 = arith.constant 0 : i32
    %c0_i32_0 = arith.constant 0 : i32
    return %c0_i32, %arg0 : i32, i32
  }
  func.func @transform_2(%arg0: i32) -> (i32, i32) {
    %c0_i32 = arith.constant 0 : i32
    %c0_i32_0 = arith.constant 0 : i32
    return %c0_i32, %arg0 : i32, i32
  }
}

</mosaic_0001>

<bundles_post_ra>
// kernel: tpu_custom_call.1
= control target key start
LH: loop header
LB: loop body
LE: loop exit
PB: predicated region body
PF: predicated region fallthrough
CT: control target
= control target key end

     0   :  { %7 = vsyncpa [#allocation5], 0  ;;  %s214_s0 = inlined_call_operand.hbm [shape: f32[9], index: 0, kind: input, shape index: {}]   ;;  %s215_s1 = inlined_call_operand.hbm [shape: f32[2,128], index: 1, kind: input, shape index: {}]   ;;  %s216_s2 = inlined_call_operand.hbm [shape: f32[1,128], index: 2, kind: output, shape index: {}]  }
   0x1   :  { %8 = vsyncpa [#allocation3], 0 }
   0x2   :  { %9 = vsyncpa [#allocation4], 0  ;;  %s187_s9 = smov [#allocation2]   ;;  %s188_s12 = smov [#allocation6]  }
   0x3   :  { %17 = dma.hbm_to_smem %s214_s0, 16, %s187_s9, [#allocation5]  }
   0x4   :  { %s24_s13 = sshll.u32 %s188_s12, 4  ;;  %s25_s13 = int_to_ptr.vmem [resolvable:$true] %s24_s13 }
   0x5   :  { %s149_s14 = scalar_lea.vmem %s25_s13, 32  ;;  %p154_p1 = scmp.lt.s32.totalorder %s25_s13, %s25_s13 }
   0x6   :  { %p150_p0 = scmp.ne.s32.totalorder %s25_s13, %s149_s14  ;;  %p155_p2 = scmp.lt.s32.totalorder %s149_s14, %s149_s14 }
   0x8   :  { %p156_p3 = por %p155_p2, %p154_p1 }
   0xa   :  { %p157_p4 = pnand %p156_p3, %p150_p0 }
   0xc   :  { %160 = shalt.err (!%p157_p4)
}
   0xd   :  { %27 = dma.hbm_to_vmem [thread:$0]  %s215_s1, 32, %s25_s13, [#allocation3]  }
   0xe   :  { %181 = dma.done.wait [#allocation5], 16  }
   0xf   :  { %182 = vsyncadd [#allocation5], 4294967280 }
  0x10   :  { %183 = dma.done.wait [#allocation3], 32  }
  0x11   :  { %184 = vsyncadd [#allocation3], 4294967264 }
  0x12   :  { %34 = sfence }
  0x13   :  { %s36_s0 = sld [smem:[#allocation2]]  ;;  %v35_v0 = vld [vmem:[#allocation6] sm:$0x3]  ;;  %s189_s24 = smov [#allocation7]  }
  0x14   :  { %s107_s17 = sld [smem:[#allocation2 + $0x1]]  ;;  %s97_s25 = sshll.u32 %s189_s24, 4  ;;  %s98_s25 = int_to_ptr.vmem [resolvable:$true] %s97_s25 }
  0x15   :  { %s108_s18 = sld [smem:[#allocation2 + $0x2]]  ;;  %s161_s26 = scalar_lea.vmem %s98_s25, 16 }
  0x16   :  { %s109_s19 = sld [smem:[#allocation2 + $0x3]]  ;;  %p162_p5 = scmp.ne.s32.totalorder %s98_s25, %s161_s26 }
  0x17   :  { %s110_s20 = sld [smem:[#allocation2 + $0x4]]  ;;  %s165_s27 = scalar_lea.vmem %s98_s25, 32 }
  0x18   :  { %s111_s21 = sld [smem:[#allocation2 + $0x5]]  ;;  %p166_p6 = scmp.lt.s32.totalorder %s98_s25, %s98_s25 }
  0x19   :  { %v45_v1 = vstv %s36_s0  ;;  %s112_s1 = sld [smem:[#allocation2 + $0x6]]  ;;  %p167_p7 = scmp.lt.s32.totalorder %s165_s27, %s161_s26 }
  0x1a   :  { %v47_v2 = vstv %s107_s17  ;;  %v46_v3 = vmul.f32 %v45_v1, %v35_v0  ;;  %s113_s22 = sld [smem:[#allocation2 + $0x7]] }
  0x1b   :  { %v48_v4 = vmul.f32 %v47_v2, %v35_v0  ;;  %v61_v5 = vstv %s108_s18  ;;  %s114_s23 = sld [smem:[#allocation2 + $0x8]]  ;;  %p168_p8 = por %p167_p7, %p166_p6 }
  0x1c   :  { %v63_v6 = vstv %s109_s19  ;;  %v62_v8 = vmul.f32 %v61_v5, %v35_v0 }
  0x1d   :  { %v50_v7 = vrot.slane %v48_v4, 1  ;;  %v64_v9 = vmul.f32 %v63_v6, %v35_v0  ;;  %v53_v10 = vstv %s110_s20  ;;  %p169_p9 = pnand %p168_p8, %p162_p5 }
  0x1e   :  { %v69_v13 = vstv %s111_s21 }
  0x1f   :  { %v52_v11 = vadd.f32 %v50_v7, %v46_v3  ;;  %v66_v12 = vrot.slane %v64_v9, 1  ;;  %v77_v23 = vstv %s112_s1 }
  0x20   :  { %v79_v25 = vstv %s113_s22 }
  0x21   :  { %v54_v14 = vadd.f32 %v53_v10, %v52_v11  ;;  %v68_v15 = vadd.f32 %v66_v12, %v62_v8  ;;  %v82_v29 = vstv %s114_s23 }
  0x23   :  { %v115_v16 = vmul.f32 -1.442695, %v54_v14  ;;  %v70_v17 = vadd.f32 %v69_v13, %v68_v15 }
  0x25   :  { %121 = vpow2.f32 %v115_v16  ;;  %v116_v18 = vmul.f32 -1.442695, %v70_v17 }
  0x27   :  { %123 = vpow2.f32 %v116_v18 }
  0x32   :  { %v122_v19 = vpop.eup %121 }
  0x33   :  { %v58_v20 = vadd.f32 1.0, %v122_v19 }
  0x34   :  { %v124_v21 = vpop.eup %123 }
  0x35   :  { %125 = vrcp.f32 %v58_v20  ;;  %v74_v22 = vadd.f32 1.0, %v124_v21 }
  0x37   :  { %127 = vrcp.f32 %v74_v22 }
  0x42   :  { %v126_v24 = vpop.eup %125 }
  0x43   :  { %v78_v26 = vmul.f32 %v126_v24, %v77_v23 }
  0x44   :  { %v128_v27 = vpop.eup %127 }
  0x45   :  { %v80_v28 = vmul.f32 %v128_v27, %v79_v25 }
  0x47   :  { %v81_v30 = vadd.f32 %v80_v28, %v78_v26 }
  0x49   :  { %v83_v31 = vadd.f32 %v82_v29, %v81_v30 }
  0x4b   :  { %v117_v32 = vmul.f32 -1.442695, %v83_v31 }
  0x4d   :  { %129 = vpow2.f32 %v117_v32 }
  0x5a   :  { %v130_v33 = vpop.eup %129 }
  0x5b   :  { %v87_v34 = vadd.f32 1.0, %v130_v33 }
  0x5d   :  { %131 = vrcp.f32 %v87_v34 }
  0x6a   :  { %v132_v35 = vpop.eup %131 }
  0x6b   :  { %90 = vst [vmem:[#allocation7] sm:$0x1] %v132_v35 }
  0x6c   :  { %172 = shalt.err (!%p169_p9)
}
  0x6d   :  { %100 = dma.vmem_to_hbm [thread:$0]  %s98_s25, 16, %s216_s2, [#allocation4]  }
  0x6e   :  { %185 = dma.done.wait [#allocation4], 16  }
  0x6f   :  { %186 = vsyncadd [#allocation4], 4294967280 }
  0x70   :  { %104 = vsyncpa [#allocation3], 1 }
  0x71   :  { %105 = vsyncpa [#allocation4], 1 }
  0x72   :  { %106 = vsyncpa [#allocation5], 1 }

</bundles_post_ra>
